<compile_context>
chip_gen: v6e
topology: v6e:2x2x1
jax: 0.10.0
libtpu: 0.0.40
codegen_flags: <defaults>
</compile_context>

<pallas_src>
import functools

import jax
import jax.numpy as jnp
from jax.experimental import pallas as pl
from jax.experimental.pallas import tpu as pltpu  # noqa: F401


def _random_palettes_kernel(lb_ref, pal_ref, lb_out_ref, pal_out_ref, *, scale):
    """Whole-array tiles in VMEM.

    lb_ref  : (1, P)   l_biases (row vector)
    pal_ref : (P, 18)  palettes
    """
    lb_out_ref[...] = scale * jnp.tanh(lb_ref[...])
    pal_out_ref[...] = jnp.tanh(pal_ref[...])


def _forward_impl(l_biases, palettes, l_bias_range):
    """RandomPalettes.forward() equivalent via one Pallas call."""
    num_palettes = l_biases.shape[0]
    pal_cols = palettes.shape[1]  # 6 * 3 = 18

    lb2 = l_biases.astype(jnp.float32).reshape(1, num_palettes)
    pal = palettes.astype(jnp.float32)

    kernel = functools.partial(
        _random_palettes_kernel,
        scale=float(l_bias_range) / 50.0,
    )

    n_elems = num_palettes * (1 + pal_cols)
    out_lb, out_pal = pl.pallas_call(
        kernel,
        out_shape=(
            jax.ShapeDtypeStruct((1, num_palettes), jnp.float32),
            jax.ShapeDtypeStruct((num_palettes, pal_cols), jnp.float32),
        ),
        in_specs=[
            pl.BlockSpec((1, num_palettes), lambda: (0, 0)),
            pl.BlockSpec((num_palettes, pal_cols), lambda: (0, 0)),
        ],
        out_specs=(
            pl.BlockSpec((1, num_palettes), lambda: (0, 0)),
            pl.BlockSpec((num_palettes, pal_cols), lambda: (0, 0)),
        ),
        cost_estimate=pl.CostEstimate(
            flops=n_elems,               # the scale mul (+ store path)
            transcendentals=n_elems,     # the tanh
            bytes_accessed=4 * n_elems * 2,
        ),
    )(lb2, pal)

    return out_lb.reshape(num_palettes), out_pal


# Differentiable wrapper (the PyTorch params are trainable): trivial tanh VJP.
@functools.partial(jax.custom_vjp, nondiff_argnums=(2,))
def random_palettes_forward(l_biases, palettes, l_bias_range):
    return _forward_impl(l_biases, palettes, l_bias_range)


def _forward_fwd(l_biases, palettes, l_bias_range):
    out = _forward_impl(l_biases, palettes, l_bias_range)
    return out, (l_biases, palettes)


def _forward_bwd(l_bias_range, residuals, cotangents):
    l_biases, palettes = residuals
    g_lb, g_pal = cotangents
    scale = float(l_bias_range) / 50.0
    t_lb = jnp.tanh(l_biases)
    t_pal = jnp.tanh(palettes)
    d_lb = g_lb * scale * (1.0 - t_lb * t_lb)
    d_pal = g_pal * (1.0 - t_pal * t_pal)
    return d_lb, d_pal


random_palettes_forward.defvjp(_forward_fwd, _forward_bwd)


if __name__ == "__main__":
    # Module hyperparameters (small, deterministic).
    l_bias_range = 10.0
    num_palettes = 8

    key = jax.random.PRNGKey(0)

    # Parameter init mirroring the PyTorch __init__.
    l_biases = jnp.zeros((num_palettes,), dtype=jnp.float32)
    u = jax.random.uniform(
        key, (num_palettes, 6 * 3), dtype=jnp.float32, minval=-1.0, maxval=1.0
    )
    palettes = jnp.arctanh(u)

    fwd = jax.jit(random_palettes_forward, static_argnums=2)
    out_lb, out_pal = fwd(l_biases, palettes, l_bias_range)
    jax.block_until_ready((out_lb, out_pal))

    # Reference check in plain JAX (same math as the PyTorch forward).
    ref_lb = (l_bias_range / 50.0) * jnp.tanh(l_biases)
    ref_pal = jnp.tanh(palettes)
    assert out_lb.shape == (num_palettes,)
    assert out_pal.shape == (num_palettes, 6 * 3)
    assert jnp.allclose(out_lb, ref_lb, atol=1e-6)
    assert jnp.allclose(out_pal, ref_pal, atol=1e-6)

    # Gradient smoke-check (custom_vjp path; params are trainable in PyTorch).
    def loss(lb, pal):
        a, b = random_palettes_forward(lb, pal, l_bias_range)
        return jnp.sum(a) + jnp.sum(b)

    g_lb, g_pal = jax.grad(loss, argnums=(0, 1))(l_biases, palettes)
    ref_g_lb = (l_bias_range / 50.0) * (1.0 - jnp.tanh(l_biases) ** 2)
    ref_g_pal = 1.0 - jnp.tanh(palettes) ** 2
    assert jnp.allclose(g_lb, ref_g_lb, atol=1e-5)
    assert jnp.allclose(g_pal, ref_g_pal, atol=1e-5)

    print("KERNEL_OK")
</pallas_src>

<mosaic_0001>
module attributes {stable_mosaic.version = 11 : i64} {
  func.func @_random_palettes_kernel(%arg0: memref<1x8xf32, #tpu.memory_space<vmem>>, %arg1: memref<8x18xf32, #tpu.memory_space<vmem>>, %arg2: memref<1x8xf32, #tpu.memory_space<vmem>>, %arg3: memref<8x18xf32, #tpu.memory_space<vmem>>) attributes {dimension_semantics = [], scalar_prefetch = 0 : i64, scratch_operands = 0 : i64, tpu.core_type = #tpu.core_type<tc>} {
    %c0 = arith.constant 0 : index
    %c0_0 = arith.constant 0 : index
    %0 = vector.load %arg0[%c0, %c0_0] : memref<1x8xf32, #tpu.memory_space<vmem>>, vector<1x8xf32>
    %1 = math.tanh %0 : vector<1x8xf32>
    %cst = arith.constant 2.000000e-01 : f32
    %2 = vector.broadcast %cst : f32 to vector<1x8xf32>
    %3 = arith.mulf %2, %1 : vector<1x8xf32>
    %c0_1 = arith.constant 0 : index
    %c0_2 = arith.constant 0 : index
    %4 = vector.load %arg2[%c0_1, %c0_2] : memref<1x8xf32, #tpu.memory_space<vmem>>, vector<1x8xf32>
    tpu.vector_store %arg2[%c0_1, %c0_2], %3 {strides = array<i32>} : memref<1x8xf32, #tpu.memory_space<vmem>>, vector<1x8xf32>,
    %c0_3 = arith.constant 0 : index
    %c0_4 = arith.constant 0 : index
    %5 = vector.load %arg1[%c0_3, %c0_4] : memref<8x18xf32, #tpu.memory_space<vmem>>, vector<8x18xf32>
    %6 = math.tanh %5 : vector<8x18xf32>
    %c0_5 = arith.constant 0 : index
    %c0_6 = arith.constant 0 : index
    %7 = vector.load %arg3[%c0_5, %c0_6] : memref<8x18xf32, #tpu.memory_space<vmem>>, vector<8x18xf32>
    tpu.vector_store %arg3[%c0_5, %c0_6], %6 {strides = array<i32>} : memref<8x18xf32, #tpu.memory_space<vmem>>, vector<8x18xf32>,
    return
  }
}

</mosaic_0001>

<bundles_post_ra>
// kernel: random_palettes_forward.1
= control target key start
LH: loop header
LB: loop body
LE: loop exit
PB: predicated region body
PF: predicated region fallthrough
CT: control target
= control target key end

     0   :  { %9 = vsyncpa [#allocation3], 0  ;;  %s173_s0 = inlined_call_operand.vmem [shape: f32[1,8], index: 0, kind: input, shape index: {}]   ;;  %s174_s1 = inlined_call_operand.hbm [shape: f32[8,18], index: 1, kind: input, shape index: {}]   ;;  %s175_s2 = inlined_call_operand.hbm [shape: f32[1,8], index: 2, kind: output, shape index: {0}]   ;;  %s176_s3 = inlined_call_operand.hbm [shape: f32[8,18], index: 3, kind: output, shape index: {1}]  }
   0x1   :  { %10 = vsyncpa [#allocation4], 0 }
   0x2   :  { %11 = vsyncpa [#allocation7], 0  ;;  %s138_s12 = smov [#allocation2]  }
   0x3   :  { %s20_s13 = sshll.u32 %s138_s12, 4  ;;  %s21_s13 = int_to_ptr.vmem [resolvable:$true] %s20_s13 }
   0x4   :  { %s80_s14 = scalar_lea.vmem %s21_s13, 128  ;;  %p85_p1 = scmp.lt.s32.totalorder %s21_s13, %s21_s13 }
   0x5   :  { %p81_p0 = scmp.ne.s32.totalorder %s21_s13, %s80_s14  ;;  %p86_p2 = scmp.lt.s32.totalorder %s80_s14, %s80_s14 }
   0x7   :  { %p87_p3 = por %p86_p2, %p85_p1 }
   0x9   :  { %p88_p4 = pnand %p87_p3, %p81_p0 }
   0xb   :  { %91 = shalt.err (!%p88_p4)
}
   0xc   :  { %23 = dma.hbm_to_vmem [thread:$0]  %s174_s1, 128, %s21_s13, [#allocation3]  }
   0xd   :  { %132 = dma.done.wait [#allocation3], 128  }
   0xe   :  { %133 = vsyncadd [#allocation3], 4294967168  ;;  %v27_v0 = vld [vmem:[%s173_s0] sm:$0x1]  ;;  %s139_s19 = smov [#allocation6]   ;;  %s140_s21 = smov [#allocation5]  }
   0xf   :  { %v32_v1 = vld [vmem:[#allocation2] sm:$0xff]  ;;  %68 = vtanh.f32 %v27_v0  ;;  %s52_s20 = sshll.u32 %s139_s19, 4  ;;  %s42_s22 = sshll.u32 %s140_s21, 4  ;;  %vm34_vm0 = vcmask 146432   ;;  %vm30_vm1 = vcmask 57344   ;;  %s53_s20 = int_to_ptr.vmem [resolvable:$true] %s52_s20  ;;  %s43_s22 = int_to_ptr.vmem [resolvable:$true] %s42_s22 }
  0x10   :  { %70 = vtanh.f32 %v32_v1  ;;  %s92_s1 = scalar_lea.vmem %s53_s20, 128  ;;  %p97_p6 = scmp.lt.s32.totalorder %s53_s20, %s53_s20 }
  0x11   :  { %p93_p5 = scmp.ne.s32.totalorder %s53_s20, %s92_s1  ;;  %p98_p7 = scmp.lt.s32.totalorder %s92_s1, %s92_s1 }
  0x13   :  { %p99_p8 = por %p98_p7, %p97_p6 }
  0x15   :  { %p100_p9 = pnand %p99_p8, %p93_p5 }
  0x1c   :  { %v69_v2 = vpop.eup %68 }
  0x1d   :  { %v71_v3 = vpop.eup %70  ;;  %v29_v4 = vmul.f32 0.2, %v69_v2 }
  0x1e   :  { %35 = vst.msk [vmem:[#allocation6] sm:$0xff] %vm34_vm0, %v71_v3 }
  0x1f   :  { %31 = vst.msk [vmem:[#allocation5] sm:$0x1] %vm30_vm1, %v29_v4 }
  0x20   :  { %103 = shalt.err (!%p100_p9)
}
  0x21   :  { %55 = dma.vmem_to_hbm [thread:$0]  %s53_s20, 128, %s176_s3, [#allocation7]  }
  0x22   :  { %s112_s24 = scalar_lea.vmem %s43_s22, 16  ;;  %s116_s25 = scalar_lea.vmem %s43_s22, 32 }
  0x23   :  { %p113_p10 = scmp.ne.s32.totalorder %s43_s22, %s112_s24  ;;  %p117_p11 = scmp.lt.s32.totalorder %s43_s22, %s43_s22 }
  0x24   :  { %p118_p12 = scmp.lt.s32.totalorder %s116_s25, %s112_s24 }
  0x26   :  { %p119_p13 = por %p118_p12, %p117_p11 }
  0x28   :  { %p120_p0 = pnand %p119_p13, %p113_p10 }
  0x2a   :  { %123 = shalt.err (!%p120_p0)
}
  0x2b   :  { %45 = dma.vmem_to_hbm [thread:$0]  %s43_s22, 16, %s175_s2, [#allocation4]  }
  0x2c   :  { %134 = dma.done.wait [#allocation4], 16  }
  0x2d   :  { %135 = vsyncadd [#allocation4], 4294967280 }
  0x2e   :  { %136 = dma.done.wait [#allocation7], 128  }
  0x2f   :  { %137 = vsyncadd [#allocation7], 4294967168 }
  0x30   :  { %62 = vsyncpa [#allocation3], 1 }
  0x31   :  { %63 = vsyncpa [#allocation4], 1 }
  0x32   :  { %64 = vsyncpa [#allocation7], 1 }

</bundles_post_ra>
